<compile_context>
chip_gen: v7x
topology: tpu7x:2x2x1
jax: 0.10.0
libtpu: 0.0.40
codegen_flags: <defaults>
</compile_context>

<pallas_src>
import functools

import jax
import jax.numpy as jnp
from jax.experimental import pallas as pl
from jax.experimental.pallas import tpu as pltpu


def _round_up(x, m):
    return (x + m - 1) // m * m


# --------------------------------------------------------------------------- #
# Generation-aware VMEM budgeting
# --------------------------------------------------------------------------- #
def _tpu_vmem_capacity_bytes():
    try:
        info = pltpu.get_tpu_info()
        cap = getattr(info, "vmem_capacity_bytes", None)
        if cap:
            return int(cap)
    except Exception:
        pass
    return 64 << 20          # conservative default == v7x per-TensorCore VMEM


def _vmem_params():
    cap = _tpu_vmem_capacity_bytes()
    budget = min(cap // 2, 48 << 20)          # working-set target for tiling
    limit = min(cap - cap // 4, 64 << 20)     # scoped-VMEM limit given to Mosaic
    return budget, max(limit, budget)


# --------------------------------------------------------------------------- #
# Primary fused kernel: patch re-layout + single full-K GEMM per block
# --------------------------------------------------------------------------- #
def _fullk_kernel(x_ref, w_ref, b_ref, o_ref, *, dims):
    C, dpb, pD, Hp, pH, Wp, pW = dims
    # bf16 cast FIRST so the expensive relayout shuffles packed data.
    v = x_ref[...].astype(w_ref.dtype)                    # (C, dpb, pD*H*W)
    v = v.reshape(C, dpb, pD, Hp, pH, Wp, pW)
    v = jnp.transpose(v, (1, 3, 5, 0, 2, 4, 6))           # (dpb,Hp,Wp,C,pD,pH,pW)
    a = v.reshape(dpb * Hp * Wp, C * pD * pH * pW)        # rows x K
    # Single MXU matmul with full-depth K; bias added inline, f32 accumulation.
    o_ref[...] = (jnp.dot(a, w_ref[...], preferred_element_type=jnp.float32)
                  + b_ref[...]).astype(o_ref.dtype)


def _fullk_patch_embed(x4, w_kn, b_1n, *, dims, out_dtype, vmem_limit):
    """x4: (B, C, Dp, pD*H*W) lane-dense view of NCDHW x (free reshape).
       w_kn: (K, N_pad) bf16 resident weight; b_1n: (1, N_pad) f32."""
    B, C, Dp, L = x4.shape
    K, N_pad = w_kn.shape
    _, dpb, pD, Hp, pH, Wp, pW = dims
    rows = dpb * Hp * Wp
    return pl.pallas_call(
        functools.partial(_fullk_kernel, dims=dims),
        out_shape=jax.ShapeDtypeStruct((B, Dp // dpb, rows, N_pad), out_dtype),
        grid_spec=pltpu.PrefetchScalarGridSpec(
            num_scalar_prefetch=0,
            grid=(B, Dp // dpb),
            in_specs=[
                # One contiguous (C, dpb, pD*H*W) slab per step: C runs of
                # dpb*pD*H*W contiguous bytes in HBM, lane-dense last dim.
                pl.BlockSpec((None, C, dpb, L), lambda b, j: (b, 0, j, 0)),
                # Full-K weight, constant index_map -> stays resident in VMEM.
                pl.BlockSpec((K, N_pad), lambda b, j: (0, 0)),
                pl.BlockSpec((1, N_pad), lambda b, j: (0, 0)),
            ],
            out_specs=pl.BlockSpec((None, None, rows, N_pad),
                                   lambda b, j: (b, j, 0, 0)),
        ),
        compiler_params=pltpu.CompilerParams(
            dimension_semantics=("parallel", "parallel"),
            vmem_limit_bytes=int(vmem_limit)),
    )(x4, w_kn, b_1n)


def _pick_dpb_fullk(B, Dp, Hp, Wp, C, pD, H, W, K, N_pad, x_isz, out_isz, budget):
    """Largest Dp-divisor (legal w.r.t. the (8,128) BlockSpec rule on the
    second-minor x dim) whose lane-padding-aware working set fits `budget`,
    preferring >=2 total parallel grid steps and <=2048 rows per tile."""
    L = _round_up(pD * H * W, 128)
    cands = [d for d in range(1, Dp + 1)
             if Dp % d == 0 and (d % 8 == 0 or d == Dp)]

    def footprint(d):
        rows = d * Hp * Wp
        x_b = 2 * C * _round_up(d, 8) * L * x_isz                 # dbl-buffered slab
        w_b = 2 * _round_up(K, 8) * N_pad * 2                     # resident bf16 weight
        o_b = 2 * _round_up(rows, 8) * N_pad * out_isz            # dbl-buffered output
        t_b = 2 * _round_up(rows, 8) * _round_up(K, 128) * 2      # relayout copies (bf16)
        return rows, x_b + w_b + o_b + t_b

    fits = [d for d in cands if footprint(d)[1] <= budget]
    good = [d for d in fits if footprint(d)[0] <= 2048] or fits or [min(cands)]
    two_step = [d for d in good if B * (Dp // d) >= 2]
    # TODO(synk): when B==1 and no smaller legal depth block exists, add an
    # Hp row-split grid axis so v7x's second TensorCore still gets work.
    return max(two_step) if two_step else max(good)


# --------------------------------------------------------------------------- #
# Secondary fused kernel: pd-split reduction (only for huge K*N weights)
# --------------------------------------------------------------------------- #
def _pdsplit_kernel(x_ref, w_ref, b_ref, o_ref, acc_ref, *, dims):
    C, dpb, Hp, pH, Wp, pW = dims
    pd = pl.program_id(2)
    v = x_ref[...].astype(w_ref.dtype)                    # (C, dpb, H, W), bf16
    v = v.reshape(C, dpb, Hp, pH, Wp, pW)
    v = jnp.transpose(v, (1, 2, 4, 0, 3, 5))              # (dpb, Hp, Wp, C, pH, pW)
    a = v.reshape(dpb * Hp * Wp, C * pH * pW)
    part = jnp.dot(a, w_ref[...], preferred_element_type=jnp.float32)

    @pl.when(pd == 0)
    def _():
        acc_ref[...] = part                               # no separate zero-init pass

    @pl.when(pd > 0)
    def _():
        acc_ref[...] += part

    @pl.when(pd == pl.num_programs(2) - 1)
    def _():
        o_ref[...] = (acc_ref[...] + b_ref[...]).astype(o_ref.dtype)


def _pdsplit_patch_embed(x6, w_pd, b_1n, *, dims, out_dtype, vmem_limit):
    """x6: (B, C, Dp, pD, H, W); w_pd: (pD, C*pH*pW, N_pad) bf16."""
    B, C, Dp, pD, H, W = x6.shape
    _, Kc, N_pad = w_pd.shape
    _, dpb, Hp, pH, Wp, pW = dims
    rows = dpb * Hp * Wp
    return pl.pallas_call(
        functools.partial(_pdsplit_kernel, dims=dims),
        out_shape=jax.ShapeDtypeStruct((B, Dp // dpb, rows, N_pad), out_dtype),
        grid_spec=pltpu.PrefetchScalarGridSpec(
            num_scalar_prefetch=0,
            grid=(B, Dp // dpb, pD),                      # reduction (pd) axis last
            in_specs=[
                pl.BlockSpec((None, C, dpb, None, H, W),
                             lambda b, j, pd: (b, 0, j, pd, 0, 0)),
                pl.BlockSpec((None, Kc, N_pad), lambda b, j, pd: (pd, 0, 0)),
                pl.BlockSpec((1, N_pad), lambda b, j, pd: (0, 0)),
            ],
            out_specs=pl.BlockSpec((None, None, rows, N_pad),
                                   lambda b, j, pd: (b, j, 0, 0)),
            scratch_shapes=[pltpu.VMEM((rows, N_pad), jnp.float32)],
        ),
        compiler_params=pltpu.CompilerParams(
            dimension_semantics=("parallel", "parallel", "arbitrary"),
            vmem_limit_bytes=int(vmem_limit)),
    )(x6, w_pd, b_1n)


def _pick_dpb_pdsplit(B, Dp, Hp, Wp, C, pH, pW, H, W, N_pad, x_isz, out_isz, budget):
    Kc = C * pH * pW
    cands = [d for d in range(1, Dp + 1) if Dp % d == 0]

    def footprint(d):
        rows = d * Hp * Wp
        x_b = 2 * C * d * _round_up(H, 8) * _round_up(W, 128) * x_isz
        w_b = 2 * _round_up(Kc, 8) * N_pad * 2
        a_b = _round_up(rows, 8) * N_pad * 4
        o_b = 2 * _round_up(rows, 8) * N_pad * out_isz
        t_b = 2 * _round_up(rows, 8) * _round_up(Kc, 128) * 2
        return rows, x_b + w_b + a_b + o_b + t_b

    fits = [d for d in cands if footprint(d)[1] <= budget]
    good = [d for d in fits if footprint(d)[0] <= 2048] or fits or [1]
    two_step = [d for d in good if B * (Dp // d) >= 2]
    return max(two_step) if two_step else max(good)


# --------------------------------------------------------------------------- #
# Last-resort fallback: XLA-side patch gather + tiled GEMM kernel
# --------------------------------------------------------------------------- #
def _gemm_kernel(a_ref, w_ref, b_ref, o_ref):
    acc = jnp.dot(a_ref[...], w_ref[...], preferred_element_type=jnp.float32)
    o_ref[...] = (acc + b_ref[...]).astype(o_ref.dtype)


def _patch_embed_gemm(patches, w_kn, b_1n, *, out_dtype, vmem_limit, tm_max=512):
    """patches: (M, K) bf16, w_kn: (K, N_pad) bf16, b_1n: (1, N_pad) f32."""
    M, K = patches.shape
    _, N_pad = w_kn.shape
    tm = min(tm_max, _round_up(M, 8))
    Mp = _round_up(M, tm)
    if Mp != M:
        patches = jnp.pad(patches, ((0, Mp - M), (0, 0)))
    out = pl.pallas_call(
        _gemm_kernel,
        out_shape=jax.ShapeDtypeStruct((Mp, N_pad), out_dtype),
        grid_spec=pltpu.PrefetchScalarGridSpec(
            num_scalar_prefetch=0,
            grid=(Mp // tm,),
            in_specs=[
                pl.BlockSpec((tm, K), lambda i: (i, 0)),
                pl.BlockSpec((K, N_pad), lambda i: (0, 0)),   # resident weight
                pl.BlockSpec((1, N_pad), lambda i: (0, 0)),
            ],
            out_specs=pl.BlockSpec((tm, N_pad), lambda i: (i, 0)),
        ),
        compiler_params=pltpu.CompilerParams(
            dimension_semantics=("parallel",),
            vmem_limit_bytes=int(vmem_limit)),
    )(patches, w_kn, b_1n)
    return out[:M]


# --------------------------------------------------------------------------- #
# Module glue
# --------------------------------------------------------------------------- #
class Config:
    def __init__(self, in_channels, hidden_size, patch_size, dropout_rate=0.1):
        self.in_channels = in_channels
        self.hidden_size = hidden_size
        self.patch_size = patch_size
        self.dropout_rate = dropout_rate


class EmbeddingsPallas:
    """JAX/Pallas port of the PyTorch `Embeddings` module.

    forward(x): x is NCDHW (B, C, D, H, W); returns (B, hidden, D/p, H/p, W/p)
    like nn.Conv3d.  Pass channels_last=True to get (B, tokens, hidden) and
    skip the final NCDHW' transpose.
    """

    def __init__(self, config, key):
        self.config = config
        C = config.in_channels
        N = config.hidden_size
        p = config.patch_size
        self.p = (p, p, p) if isinstance(p, int) else tuple(p)
        pD, pH, pW = self.p
        fan_in = C * pD * pH * pW
        k_w, k_b = jax.random.split(key)
        bound = 1.0 / float(fan_in) ** 0.5
        # PyTorch Conv3d default init: weight (O, I, pD, pH, pW), bias (O,)
        self.weight = jax.random.uniform(
            k_w, (N, C, pD, pH, pW), jnp.float32, -bound, bound)
        self.bias = jax.random.uniform(k_b, (N,), jnp.float32, -bound, bound)

        # Pre-packed / padded parameters (tiny, done once).
        N_pad = _round_up(N, 128)                 # lane-dense output tiles
        self._n_pad = N_pad
        K = C * pD * pH * pW
        # Full-K weight, K ordered (c, pd, ph, pw) with pw minor (matches the
        # in-kernel relayout; pw stays the minor K axis).
        self._w_kn = jnp.pad(self.weight.reshape(N, K).T,
                             ((0, 0), (0, N_pad - N))).astype(jnp.bfloat16)
        # Per-pD weight slices for the pd-split fallback path.
        w_pd = jnp.transpose(self.weight, (2, 1, 3, 4, 0)).reshape(
            pD, C * pH * pW, N)
        self._w_pd = jnp.pad(
            w_pd, ((0, 0), (0, 0), (0, N_pad - N))).astype(jnp.bfloat16)
        self._b_1n = jnp.pad(self.bias, (0, N_pad - N)).reshape(
            1, N_pad).astype(jnp.float32)

        self._impl = "auto"   # decided on the first call (cheap try/except)
        self._fns = {}

        # NOTE: the original __init__ builds nn.Dropout(config.dropout_rate),
        # but forward() never applies it, so it is intentionally omitted here.

    # ----------------------------------------------------------------------- #
    def _get_fns(self, xshape, xdtype, channels_last):
        key = (tuple(xshape), jnp.dtype(xdtype).name, bool(channels_last))
        fns = self._fns.get(key)
        if fns is not None:
            return fns

        B, C, D, H, W = xshape
        pD, pH, pW = self.p
        assert C == self.config.in_channels
        assert D % pD == 0 and H % pH == 0 and W % pW == 0
        N = self.config.hidden_size
        N_pad = self._n_pad
        Dp, Hp, Wp = D // pD, H // pH, W // pW
        K = C * pD * pH * pW
        x_isz = jnp.dtype(xdtype).itemsize
        out_isz = jnp.dtype(xdtype).itemsize
        budget, vmem_limit = _vmem_params()
        w_kn, w_pd, b_1n = self._w_kn, self._w_pd, self._b_1n

        def _postprocess(flat):
            # Rows are ordered (b, dp, hp, wp) in every path.
            out5 = flat.reshape(B, Dp, Hp, Wp, N_pad)[..., :N]
            if channels_last:
                return out5.reshape(B, Dp * Hp * Wp, N)       # (B, tokens, N)
            # Conv3d NCDHW' semantics; only the (small) output is transposed.
            return jnp.transpose(out5, (0, 4, 1, 2, 3))

        # Full-K path iff the resident weight leaves room for x / out tiles.
        use_fullk = 2 * _round_up(K, 8) * N_pad * 2 <= budget // 2

        if use_fullk:
            dpb = _pick_dpb_fullk(B, Dp, Hp, Wp, C, pD, H, W, K, N_pad,
                                  x_isz, out_isz, budget)
            dims = (C, dpb, pD, Hp, pH, Wp, pW)

            def fused(x):
                x4 = x.reshape(B, C, Dp, pD * H * W)          # free lane-dense view
                flat = _fullk_patch_embed(x4, w_kn, b_1n, dims=dims,
                                          out_dtype=x.dtype,
                                          vmem_limit=vmem_limit)
                return _postprocess(flat)
        else:
            dpb = _pick_dpb_pdsplit(B, Dp, Hp, Wp, C, pH, pW, H, W, N_pad,
                                    x_isz, out_isz, budget)
            dims = (C, dpb, Hp, pH, Wp, pW)

            def fused(x):
                x6 = x.reshape(B, C, Dp, pD, H, W)            # free view
                flat = _pdsplit_patch_embed(x6, w_pd, b_1n, dims=dims,
                                            out_dtype=x.dtype,
                                            vmem_limit=vmem_limit)
                return _postprocess(flat)

        def fallback(x):
            xb = x.astype(jnp.bfloat16)
            xp = xb.reshape(B, C, Dp, pD, Hp, pH, Wp, pW)
            xp = jnp.transpose(xp, (0, 2, 4, 6, 1, 3, 5, 7))
            patches = xp.reshape(B * Dp * Hp * Wp, K)
            flat = _patch_embed_gemm(patches, w_kn, b_1n, out_dtype=x.dtype,
                                     vmem_limit=vmem_limit)
            return _postprocess(flat)

        fns = {"fused": jax.jit(fused), "fallback": jax.jit(fallback)}
        self._fns[key] = fns
        return fns

    # ----------------------------------------------------------------------- #
    def __call__(self, x, channels_last=False):
        fns = self._get_fns(x.shape, x.dtype, channels_last)
        if self._impl == "fused":
            return fns["fused"](x)
        if self._impl == "fallback":
            return fns["fallback"](x)
        # First call: try the fused (gather-in-kernel) path once.  If Mosaic
        # rejects the in-kernel high-rank relayout on this compiler version,
        # drop to the XLA-gather + GEMM path.  No extra fused-vs-fallback
        # allclose here (cheap warmup); numerics are validated in __main__.
        try:
            out = jax.block_until_ready(fns["fused"](x))
            self._impl = "fused"
            return out
        except Exception:
            self._impl = "fallback"
            return fns["fallback"](x)


# --------------------------------------------------------------------------- #
# Main
# --------------------------------------------------------------------------- #
if __name__ == "__main__":
    key = jax.random.PRNGKey(0)
    k_param, k_x = jax.random.split(key)

    # Small shapes consistent with the module: B=2, C=4, spatial 16^3, patch 4.
    cfg = Config(in_channels=4, hidden_size=32, patch_size=4, dropout_rate=0.1)
    model = EmbeddingsPallas(cfg, k_param)

    x = jax.random.normal(k_x, (2, 4, 16, 16, 16), jnp.float32)

    out = jax.block_until_ready(model(x))                  # NCDHW', like Conv3d
    assert out.shape == (2, 32, 4, 4, 4), out.shape

    # Reference: plain-JAX conv3d (f32).  The kernel uses bf16 operands with
    # f32 accumulation, hence the modest tolerance.
    ref = jax.lax.conv_general_dilated(
        x, model.weight,
        window_strides=model.p, padding="VALID",
        dimension_numbers=("NCDHW", "OIDHW", "NCDHW"),
    ) + model.bias.reshape(1, -1, 1, 1, 1)
    assert jnp.allclose(out, ref, atol=3e-2, rtol=3e-2), "mismatch vs conv3d ref"

    # Channels-last / token path (skips the output transpose entirely).
    tok = jax.block_until_ready(model(x, channels_last=True))
    assert tok.shape == (2, 64, 32), tok.shape
    assert jnp.allclose(
        tok, jnp.transpose(out, (0, 2, 3, 4, 1)).reshape(2, 64, 32),
        atol=1e-5, rtol=1e-5)

    print("KERNEL_OK")
</pallas_src>

<mosaic_0001>
module attributes {stable_mosaic.version = 11 : i64} {
  func.func @_fullk_kernel(%arg0: i32, %arg1: i32, %arg2: memref<1x4x4x1024xf32, #tpu.memory_space<vmem>>, %arg3: memref<256x128xbf16, #tpu.memory_space<vmem>>, %arg4: memref<1x128xf32, #tpu.memory_space<vmem>>, %arg5: memref<1x1x64x128xf32, #tpu.memory_space<vmem>>) attributes {dimension_semantics = [#tpu.dimension_semantics<parallel>, #tpu.dimension_semantics<parallel>], iteration_bounds = array<i64: 2, 1>, scalar_prefetch = 0 : i64, scratch_operands = 0 : i64, tpu.core_type = #tpu.core_type<tc>, window_params = [{transform_indices = @transform_0, window_bounds = array<i64: 1, 4, 4, 1024>}, {pipeline_mode = #tpu.pipeline_mode<synchronous>, transform_indices = @transform_1, window_bounds = array<i64: 256, 128>}, {pipeline_mode = #tpu.pipeline_mode<synchronous>, transform_indices = @transform_2, window_bounds = array<i64: 1, 128>}, {transform_indices = @transform_3, window_bounds = array<i64: 1, 1, 64, 128>}]} {
    %c0 = arith.constant 0 : index
    %c0_0 = arith.constant 0 : index
    %c0_1 = arith.constant 0 : index
    %c0_2 = arith.constant 0 : index
    %0 = vector.load %arg2[%c0, %c0_0, %c0_1, %c0_2] : memref<1x4x4x1024xf32, #tpu.memory_space<vmem>>, vector<1x4x4x1024xf32>
    %1 = vector.shape_cast %0 : vector<1x4x4x1024xf32> to vector<4x4x1024xf32>
    %2 = arith.truncf %1 : vector<4x4x1024xf32> to vector<4x4x1024xbf16>
    %3 = vector.shape_cast %2 : vector<4x4x1024xbf16> to vector<4x4x4x4x4x4x4xbf16>
    %4 = tpu.transpose %3, [1, 3, 5, 0, 2, 4, 6] : vector<4x4x4x4x4x4x4xbf16> -> vector<4x4x4x4x4x4x4xbf16>
    %5 = vector.shape_cast %4 : vector<4x4x4x4x4x4x4xbf16> to vector<64x256xbf16>
    %c0_3 = arith.constant 0 : index
    %c0_4 = arith.constant 0 : index
    %6 = vector.load %arg3[%c0_3, %c0_4] : memref<256x128xbf16, #tpu.memory_space<vmem>>, vector<256x128xbf16>
    %cst = arith.constant dense<0.000000e+00> : vector<64x128xf32>
    %7 = tpu.matmul %5, %6, %cst {dimension_numbers = #tpu.dot_dimension_numbers<[1], [0], [0], [1], [0, 0, 1, 1], [], []>} : vector<64x256xbf16>, vector<256x128xbf16>, vector<64x128xf32> -> vector<64x128xf32>
    %c0_5 = arith.constant 0 : index
    %c0_6 = arith.constant 0 : index
    %8 = vector.load %arg4[%c0_5, %c0_6] : memref<1x128xf32, #tpu.memory_space<vmem>>, vector<1x128xf32>
    %9 = vector.broadcast %8 : vector<1x128xf32> to vector<64x128xf32>
    %10 = arith.addf %7, %9 : vector<64x128xf32>
    %c0_7 = arith.constant 0 : index
    %c0_8 = arith.constant 0 : index
    %c0_9 = arith.constant 0 : index
    %c0_10 = arith.constant 0 : index
    %11 = vector.load %arg5[%c0_7, %c0_8, %c0_9, %c0_10] : memref<1x1x64x128xf32, #tpu.memory_space<vmem>>, vector<1x1x64x128xf32>
    %12 = vector.shape_cast %11 : vector<1x1x64x128xf32> to vector<64x128xf32>
    %13 = vector.shape_cast %10 : vector<64x128xf32> to vector<1x1x64x128xf32>
    tpu.vector_store %arg5[%c0_7, %c0_8, %c0_9, %c0_10], %13 {strides = array<i32>} : memref<1x1x64x128xf32, #tpu.memory_space<vmem>>, vector<1x1x64x128xf32>,
    return
  }
  func.func @transform_0(%arg0: i32, %arg1: i32) -> (i32, i32, i32, i32) {
    %c0_i32 = arith.constant 0 : i32
    %c0_i32_0 = arith.constant 0 : i32
    %c0_i32_1 = arith.constant 0 : i32
    return %arg0, %c0_i32, %arg1, %c0_i32_0 : i32, i32, i32, i32
  }
  func.func @transform_1(%arg0: i32, %arg1: i32) -> (i32, i32) {
    %c0_i32 = arith.constant 0 : i32
    %c0_i32_0 = arith.constant 0 : i32
    %c0_i32_1 = arith.constant 0 : i32
    return %c0_i32, %c0_i32_0 : i32, i32
  }
  func.func @transform_2(%arg0: i32, %arg1: i32) -> (i32, i32) {
    %c0_i32 = arith.constant 0 : i32
    %c0_i32_0 = arith.constant 0 : i32
    %c0_i32_1 = arith.constant 0 : i32
    return %c0_i32, %c0_i32_0 : i32, i32
  }
  func.func @transform_3(%arg0: i32, %arg1: i32) -> (i32, i32, i32, i32) {
    %c0_i32 = arith.constant 0 : i32
    %c0_i32_0 = arith.constant 0 : i32
    %c0_i32_1 = arith.constant 0 : i32
    return %arg0, %arg1, %c0_i32, %c0_i32_0 : i32, i32, i32, i32
  }
}

module attributes {stable_mosaic.version = 11 : i64} {
  func.func @_gemm_kernel(%arg0: i32, %arg1: memref<128x256xbf16, #tpu.memory_space<vmem>>, %arg2: memref<256x128xbf16, #tpu.memory_space<vmem>>, %arg3: memref<1x128xf32, #tpu.memory_space<vmem>>, %arg4: memref<128x128xf32, #tpu.memory_space<vmem>>) attributes {dimension_semantics = [#tpu.dimension_semantics<parallel>], iteration_bounds = array<i64: 1>, scalar_prefetch = 0 : i64, scratch_operands = 0 : i64, tpu.core_type = #tpu.core_type<tc>, window_params = [{transform_indices = @transform_0, window_bounds = array<i64: 128, 256>}, {pipeline_mode = #tpu.pipeline_mode<synchronous>, transform_indices = @transform_1, window_bounds = array<i64: 256, 128>}, {pipeline_mode = #tpu.pipeline_mode<synchronous>, transform_indices = @transform_2, window_bounds = array<i64: 1, 128>}, {transform_indices = @transform_3, window_bounds = array<i64: 128, 128>}]} {
    %c0 = arith.constant 0 : index
    %c0_0 = arith.constant 0 : index
    %0 = vector.load %arg1[%c0, %c0_0] : memref<128x256xbf16, #tpu.memory_space<vmem>>, vector<128x256xbf16>
    %c0_1 = arith.constant 0 : index
    %c0_2 = arith.constant 0 : index
    %1 = vector.load %arg2[%c0_1, %c0_2] : memref<256x128xbf16, #tpu.memory_space<vmem>>, vector<256x128xbf16>
    %cst = arith.constant dense<0.000000e+00> : vector<128x128xf32>
    %2 = tpu.matmul %0, %1, %cst {dimension_numbers = #tpu.dot_dimension_numbers<[1], [0], [0], [1], [0, 0, 1, 1], [], []>} : vector<128x256xbf16>, vector<256x128xbf16>, vector<128x128xf32> -> vector<128x128xf32>
    %c0_3 = arith.constant 0 : index
    %c0_4 = arith.constant 0 : index
    %3 = vector.load %arg3[%c0_3, %c0_4] : memref<1x128xf32, #tpu.memory_space<vmem>>, vector<1x128xf32>
    %4 = vector.broadcast %3 : vector<1x128xf32> to vector<128x128xf32>
    %5 = arith.addf %2, %4 : vector<128x128xf32>
    %c0_5 = arith.constant 0 : index
    %c0_6 = arith.constant 0 : index
    %6 = vector.load %arg4[%c0_5, %c0_6] : memref<128x128xf32, #tpu.memory_space<vmem>>, vector<128x128xf32>
    tpu.vector_store %arg4[%c0_5, %c0_6], %5 {strides = array<i32>} : memref<128x128xf32, #tpu.memory_space<vmem>>, vector<128x128xf32>,
    return
  }
  func.func @transform_0(%arg0: i32) -> (i32, i32) {
    %c0_i32 = arith.constant 0 : i32
    %c0_i32_0 = arith.constant 0 : i32
    return %arg0, %c0_i32 : i32, i32
  }
  func.func @transform_1(%arg0: i32) -> (i32, i32) {
    %c0_i32 = arith.constant 0 : i32
    %c0_i32_0 = arith.constant 0 : i32
    %c0_i32_1 = arith.constant 0 : i32
    return %c0_i32, %c0_i32_0 : i32, i32
  }
  func.func @transform_2(%arg0: i32) -> (i32, i32) {
    %c0_i32 = arith.constant 0 : i32
    %c0_i32_0 = arith.constant 0 : i32
    %c0_i32_1 = arith.constant 0 : i32
    return %c0_i32, %c0_i32_0 : i32, i32
  }
  func.func @transform_3(%arg0: i32) -> (i32, i32) {
    %c0_i32 = arith.constant 0 : i32
    %c0_i32_0 = arith.constant 0 : i32
    return %arg0, %c0_i32 : i32, i32
  }
}

</mosaic_0001>

<bundles_post_ra>
// kernel: fallback.1
= control target key start
LH: loop header
LB: loop body
LE: loop exit
PB: predicated region body
PF: predicated region fallthrough
CT: control target
= control target key end

     0   :  { %s701_s1 = inlined_call_operand.vmem [shape: bf16[256,128], index: 1, kind: input, shape index: {}]   ;;  %s702_s0 = inlined_call_operand.vmem [shape: bf16[128,256], index: 0, kind: input, shape index: {}]   ;;  %s703_s2 = inlined_call_operand.vmem [shape: f32[1,128], index: 2, kind: input, shape index: {}]   ;;  %s704_s3 = inlined_call_operand.vmem [shape: f32[128,128], index: 3, kind: output, shape index: {}]  }
   0x1   :  { %v476_v0 = vld [vmem:[%s701_s1 + $0x40] sm:$0xff]   ;;  %v478_v2 = vld [vmem:[%s701_s1 + $0x48] sm:$0xff]   ;;  %v480_v4 = vld [vmem:[%s701_s1 + $0x50] sm:$0xff]  }
   0x2   :  { %v477_v1 = vld [vmem:[%s701_s1] sm:$0xff]   ;;  %396 = vmatprep.subr.bf16.mxu0 %v476_v0  ;;  %460 = vmatprep.subr.bf16.mxu1 %v476_v0  ;;  %v479_v3 = vld [vmem:[%s701_s1 + $0x8] sm:$0xff]   ;;  %v481_v5 = vld [vmem:[%s701_s1 + $0x10] sm:$0xff]  }
   0x3   :  { %397 = vmatpush3.bf16.msra.mxu0 %v477_v1  ;;  %468 = vmatpush3.bf16.msra.mxu1 %v477_v1  ;;  %v482_v6 = vld [vmem:[%s701_s1 + $0x58] sm:$0xff]   ;;  %v484_v8 = vld [vmem:[%s701_s1 + $0x60] sm:$0xff]   ;;  %v486_v10 = vld [vmem:[%s701_s1 + $0x68] sm:$0xff]  }
   0x4   :  { %398 = vmatprep.subr.bf16.mxu0 %v478_v2  ;;  %461 = vmatprep.subr.bf16.mxu1 %v478_v2  ;;  %v483_v7 = vld [vmem:[%s701_s1 + $0x18] sm:$0xff]   ;;  %v485_v9 = vld [vmem:[%s701_s1 + $0x20] sm:$0xff]   ;;  %v487_v13 = vld [vmem:[%s701_s1 + $0x28] sm:$0xff]  }
   0x5   :  { %v494_v11 = vld [vmem:[%s702_s0 + $0x4] ss:$8 sps:$4 sm:$0xff]   ;;  %v488_v14 = vld [vmem:[%s701_s1 + $0x70] sm:$0xff]   ;;  %v490_v16 = vld [vmem:[%s701_s1 + $0x78] sm:$0xff]  }
   0x6   :  { %v497_v12 = vld [vmem:[%s702_s0 + $0x44] ss:$8 sps:$4 sm:$0xff]   ;;  %278 = vmatprep.mubr.bf16.mxu0 %v494_v11  ;;  %v489_v15 = vld [vmem:[%s701_s1 + $0x30] sm:$0xff]   ;;  %v491_v17 = vld [vmem:[%s701_s1 + $0x38] sm:$0xff]  }
   0x7   :  { %399 = vmatpush3.bf16.msra.mxu0 %v479_v3  ;;  %469 = vmatpush3.bf16.msra.mxu1 %v479_v3  ;;  %v492_v18 = vld [vmem:[%s702_s0] ss:$8 sps:$4 sm:$0xff]   ;;  %v498_v20 = vld [vmem:[%s702_s0 + $0x14] ss:$8 sps:$4 sm:$0xff]   ;;  %v502_v22 = vld [vmem:[%s702_s0 + $0x10] ss:$8 sps:$4 sm:$0xff]  }
   0x8   :  { %400 = vmatprep.subr.bf16.mxu0 %v480_v4  ;;  %462 = vmatprep.subr.bf16.mxu1 %v480_v4  ;;  %v495_v19 = vld [vmem:[%s702_s0 + $0x40] ss:$8 sps:$4 sm:$0xff]   ;;  %v500_v21 = vld [vmem:[%s702_s0 + $0x54] ss:$8 sps:$4 sm:$0xff]   ;;  %v503_v23 = vld [vmem:[%s702_s0 + $0x50] ss:$8 sps:$4 sm:$0xff]  }
   0x9   :  { %310 = vmatprep.mubr.bf16.mxu1 %v497_v12  ;;  %v504_v24 = vld [vmem:[%s702_s0 + $0x24] ss:$8 sps:$4 sm:$0xff]   ;;  %v508_v26 = vld [vmem:[%s702_s0 + $0x20] ss:$8 sps:$4 sm:$0xff]   ;;  %v510_v28 = vld [vmem:[%s702_s0 + $0x34] ss:$8 sps:$4 sm:$0xff]  }
   0xa   :  { %v506_v25 = vld [vmem:[%s702_s0 + $0x64] ss:$8 sps:$4 sm:$0xff]   ;;  %v509_v27 = vld [vmem:[%s702_s0 + $0x60] ss:$8 sps:$4 sm:$0xff]   ;;  %v512_v29 = vld [vmem:[%s702_s0 + $0x74] ss:$8 sps:$4 sm:$0xff]  }
   0xb   :  { %401 = vmatpush3.bf16.msra.mxu0 %v481_v5  ;;  %470 = vmatpush3.bf16.msra.mxu1 %v481_v5  ;;  %v514_v30 = vld [vmem:[%s702_s0 + $0x30] ss:$8 sps:$4 sm:$0xff]   ;;  %v635_v34 = vld [vmem:[%s703_s2] ss:$0 sm:$0xff] }
   0xc   :  { %402 = vmatprep.subr.bf16.mxu0 %v482_v6  ;;  %463 = vmatprep.subr.bf16.mxu1 %v482_v6  ;;  %v515_v31 = vld [vmem:[%s702_s0 + $0x70] ss:$8 sps:$4 sm:$0xff]  }
   0xf   :  { %403 = vmatpush3.bf16.msra.mxu0 %v483_v7  ;;  %471 = vmatpush3.bf16.msra.mxu1 %v483_v7 }
  0x10   :  { %404 = vmatprep.subr.bf16.mxu0 %v484_v8  ;;  %464 = vmatprep.subr.bf16.mxu1 %v484_v8 }
  0x13   :  { %405 = vmatpush3.bf16.msra.mxu0 %v485_v9  ;;  %472 = vmatpush3.bf16.msra.mxu1 %v485_v9 }
  0x14   :  { %406 = vmatprep.subr.bf16.mxu0 %v486_v10  ;;  %465 = vmatprep.subr.bf16.mxu1 %v486_v10 }
  0x17   :  { %407 = vmatpush3.bf16.msra.mxu0 %v487_v13  ;;  %473 = vmatpush3.bf16.msra.mxu1 %v487_v13 }
  0x18   :  { %408 = vmatprep.subr.bf16.mxu0 %v488_v14  ;;  %466 = vmatprep.subr.bf16.mxu1 %v488_v14 }
  0x1b   :  { %409 = vmatpush3.bf16.msra.mxu0 %v489_v15  ;;  %474 = vmatpush3.bf16.msra.mxu1 %v489_v15 }
  0x1c   :  { %410 = vmatprep.subr.bf16.mxu0 %v490_v16  ;;  %467 = vmatprep.subr.bf16.mxu1 %v490_v16 }
  0x1f   :  { %411 = vmatpush3.bf16.msra.mxu0 %v491_v17  ;;  %475 = vmatpush3.bf16.msra.mxu1 %v491_v17 }
  0x22   :  { %279 = vmatmul.mubr.bf16.vlgmr.msra.gmra.mrb[0].mxu0 %v492_v18  ;;  %311 = vmatmul.mubr.bf16.vlgmr.msra.gmra.mrb[0].mxu1 %v495_v19 }
  0x23   :  { %286 = vmatprep.mubr.bf16.mxu0 %v498_v20  ;;  %318 = vmatprep.mubr.bf16.mxu1 %v500_v21 }
  0x2a   :  { %287 = vmatmul.mubr.bf16.gmra.mrb[4].mxu0 %v502_v22  ;;  %319 = vmatmul.mubr.bf16.gmra.mrb[4].mxu1 %v503_v23 }
  0x2b   :  { %294 = vmatprep.mubr.bf16.mxu0 %v504_v24  ;;  %326 = vmatprep.mubr.bf16.mxu1 %v506_v25 }
  0x32   :  { %295 = vmatmul.mubr.bf16.gmra.mrb[8].mxu0 %v508_v26  ;;  %327 = vmatmul.mubr.bf16.gmra.mrb[8].mxu1 %v509_v27 }
  0x33   :  { %302 = vmatprep.mubr.bf16.mxu0 %v510_v28  ;;  %334 = vmatprep.mubr.bf16.mxu1 %v512_v29 }
  0x3a   :  { %303 = vmatmul.mubr.bf16.gmra.mrb[12].mxu0 %v514_v30  ;;  %335 = vmatmul.mubr.bf16.gmra.mrb[12].mxu1 %v515_v31 }
  0xf5   :  { %v412_v32 = vpop.f32.mrb[0].mxu0  ;;  %v436_v33 = vpop.f32.mrb[0].mxu1 }
  0xf6   :  { %v413_v35 = vpop.f32.mrb[1].mxu0  ;;  %v437_v36 = vpop.f32.mrb[1].mxu1 }
  0xf7   :  { %v414_v37 = vadd.f32 %v413_v35, %v412_v32  ;;  %v438_v38 = vadd.f32 %v437_v36, %v436_v33  ;;  %v415_v39 = vpop.f32.mrb[2].mxu0  ;;  %v439_v40 = vpop.f32.mrb[2].mxu1 }
  0xf8   :  { %v416_v41 = vpop.f32.mrb[3].mxu0  ;;  %v440_v42 = vpop.f32.mrb[3].mxu1 }
  0xf9   :  { %v281_v43 = vadd.f32 %v414_v37, %v635_v34  ;;  %v313_v44 = vadd.f32 %v438_v38, %v635_v34  ;;  %v417_v45 = vadd.f32 %v416_v41, %v415_v39  ;;  %v441_v46 = vadd.f32 %v440_v42, %v439_v40 }
  0xfb   :  { %343 = vst [vmem:[%s704_s3] sm:$0xff] %v281_v43  ;;  %351 = vst [vmem:[%s704_s3 + $0x40] sm:$0xff] %v313_v44  ;;  %v284_v47 = vadd.f32 %v417_v45, %v635_v34  ;;  %v316_v48 = vadd.f32 %v441_v46, %v635_v34 }
  0xfd   :  { %344 = vst [vmem:[%s704_s3 + $0x8] sm:$0xff] %v284_v47  ;;  %352 = vst [vmem:[%s704_s3 + $0x48] sm:$0xff] %v316_v48  ;;  %v418_v49 = vpop.f32.mrb[4].mxu0  ;;  %v442_v50 = vpop.f32.mrb[4].mxu1 }
  0xfe   :  { %v419_v51 = vpop.f32.mrb[5].mxu0  ;;  %v443_v52 = vpop.f32.mrb[5].mxu1 }
  0xff   :  { %v420_v53 = vadd.f32 %v419_v51, %v418_v49  ;;  %v444_v54 = vadd.f32 %v443_v52, %v442_v50  ;;  %v421_v55 = vpop.f32.mrb[6].mxu0  ;;  %v445_v56 = vpop.f32.mrb[6].mxu1 }
 0x100   :  { %v422_v57 = vpop.f32.mrb[7].mxu0  ;;  %v446_v58 = vpop.f32.mrb[7].mxu1 }
 0x101   :  { %v289_v59 = vadd.f32 %v420_v53, %v635_v34  ;;  %v321_v60 = vadd.f32 %v444_v54, %v635_v34  ;;  %v423_v61 = vadd.f32 %v422_v57, %v421_v55  ;;  %v447_v62 = vadd.f32 %v446_v58, %v445_v56 }
 0x103   :  { %345 = vst [vmem:[%s704_s3 + $0x10] sm:$0xff] %v289_v59  ;;  %353 = vst [vmem:[%s704_s3 + $0x50] sm:$0xff] %v321_v60  ;;  %v292_v63 = vadd.f32 %v423_v61, %v635_v34  ;;  %v324_v0 = vadd.f32 %v447_v62, %v635_v34 }
 0x105   :  { %346 = vst [vmem:[%s704_s3 + $0x18] sm:$0xff] %v292_v63  ;;  %354 = vst [vmem:[%s704_s3 + $0x58] sm:$0xff] %v324_v0  ;;  %v424_v1 = vpop.f32.mrb[8].mxu0  ;;  %v448_v2 = vpop.f32.mrb[8].mxu1 }
 0x106   :  { %v425_v3 = vpop.f32.mrb[9].mxu0  ;;  %v449_v4 = vpop.f32.mrb[9].mxu1 }
 0x107   :  { %v426_v5 = vadd.f32 %v425_v3, %v424_v1  ;;  %v450_v6 = vadd.f32 %v449_v4, %v448_v2  ;;  %v427_v7 = vpop.f32.mrb[10].mxu0  ;;  %v451_v8 = vpop.f32.mrb[10].mxu1 }
 0x108   :  { %v428_v9 = vpop.f32.mrb[11].mxu0  ;;  %v452_v10 = vpop.f32.mrb[11].mxu1 }
 0x109   :  { %v297_v11 = vadd.f32 %v426_v5, %v635_v34  ;;  %v329_v12 = vadd.f32 %v450_v6, %v635_v34  ;;  %v429_v13 = vadd.f32 %v428_v9, %v427_v7  ;;  %v453_v14 = vadd.f32 %v452_v10, %v451_v8 }
 0x10b   :  { %347 = vst [vmem:[%s704_s3 + $0x20] sm:$0xff] %v297_v11  ;;  %355 = vst [vmem:[%s704_s3 + $0x60] sm:$0xff] %v329_v12  ;;  %v300_v15 = vadd.f32 %v429_v13, %v635_v34  ;;  %v332_v16 = vadd.f32 %v453_v14, %v635_v34 }
 0x10d   :  { %348 = vst [vmem:[%s704_s3 + $0x28] sm:$0xff] %v300_v15  ;;  %356 = vst [vmem:[%s704_s3 + $0x68] sm:$0xff] %v332_v16  ;;  %v430_v17 = vpop.f32.mrb[12].mxu0  ;;  %v454_v18 = vpop.f32.mrb[12].mxu1 }
 0x10e   :  { %v431_v19 = vpop.f32.mrb[13].mxu0  ;;  %v455_v20 = vpop.f32.mrb[13].mxu1 }
 0x10f   :  { %v432_v21 = vadd.f32 %v431_v19, %v430_v17  ;;  %v456_v22 = vadd.f32 %v455_v20, %v454_v18  ;;  %v433_v23 = vpop.f32.mrb[14].mxu0  ;;  %v457_v24 = vpop.f32.mrb[14].mxu1 }
 0x110   :  { %v434_v25 = vpop.f32.mrb[15].mxu0  ;;  %v458_v26 = vpop.f32.mrb[15].mxu1 }
 0x111   :  { %v305_v27 = vadd.f32 %v432_v21, %v635_v34  ;;  %v337_v28 = vadd.f32 %v456_v22, %v635_v34  ;;  %v435_v29 = vadd.f32 %v434_v25, %v433_v23  ;;  %v459_v30 = vadd.f32 %v458_v26, %v457_v24 }
 0x113   :  { %349 = vst [vmem:[%s704_s3 + $0x30] sm:$0xff] %v305_v27  ;;  %357 = vst [vmem:[%s704_s3 + $0x70] sm:$0xff] %v337_v28  ;;  %v308_v31 = vadd.f32 %v435_v29, %v635_v34  ;;  %v340_v32 = vadd.f32 %v459_v30, %v635_v34 }
 0x115   :  { %350 = vst [vmem:[%s704_s3 + $0x38] sm:$0xff] %v308_v31  ;;  %358 = vst [vmem:[%s704_s3 + $0x78] sm:$0xff] %v340_v32 }

</bundles_post_ra>
